<compile_context>
chip_gen: v7x
topology: tpu7x:2x2x1
jax: 0.10.0
libtpu: 0.0.40
codegen_flags: <defaults>
</compile_context>

<pallas_src>
import jax
import jax.numpy as jnp
from jax.experimental import pallas as pl
from jax.experimental.pallas import tpu as pltpu


def _outconv_kernel(x_ref, w_ref, b_ref, o_ref):
    """x_ref: (C_in, TS)  w_ref: (C_out, C_in)  b_ref: (C_out, 1)  o_ref: (C_out, TS)."""
    c_in, ts = x_ref.shape
    c_out = o_ref.shape[0]

    b_f32 = b_ref[...].astype(jnp.float32)                    # (C_out, 1), hoisted once

    if c_in <= 16 and c_out <= 16:
        # Tiny channels: a matmul this small uses <0.1% of the MXU and pays the
        # result-FIFO drain for nothing.  Do C_in broadcast multiply-adds on the
        # VPU instead, carrying a single (C_out, TS) f32 accumulator.  x rows are
        # read straight from the ref and cast per-row (no full-block f32 copy,
        # which would double vld/vst traffic in this mem-bound kernel).  The
        # spatial tile for this path is capped in the wrapper (<= 8192 lanes) so
        # the unrolled loop's intermediates stay small.
        acc = jnp.broadcast_to(b_f32, (c_out, ts))             # bias broadcast, hoisted
        for ci in range(c_in):                                 # static, <= 16 iters
            w_col = w_ref[:, ci:ci + 1].astype(jnp.float32)    # (C_out, 1)  lane-bcast
            x_row = x_ref[ci:ci + 1, :].astype(jnp.float32)    # (1, TS)     sublane-bcast
            acc = acc + w_col * x_row
        o_ref[...] = acc.astype(o_ref.dtype)
    else:
        # Real channel counts: native-dtype operands straight to the MXU with
        # f32 accumulation; only the bias is cast.
        acc = jnp.dot(w_ref[...], x_ref[...],
                      preferred_element_type=jnp.float32)      # (C_out, TS) f32
        o_ref[...] = (acc + b_f32).astype(o_ref.dtype)


def _pad8(c):
    return ((c + 7) // 8) * 8


def _vmem_limits():
    """Generation-aware scoped-VMEM limit and per-tile budget (bytes)."""
    try:
        cap = int(pltpu.get_tpu_info().vmem_capacity_bytes)
    except Exception:
        cap = 64 << 20                      # conservative fallback (v7x physical VMEM)
    # Scoped limit: half of physical -> ~64 MiB on v5e/v6e (128 MiB), ~32 MiB on v7x.
    limit = max(32 << 20, min(cap // 2, 64 << 20))
    # Tile budget leaves headroom for weight/bias buffers and compiler scratch.
    budget = (limit * 3) // 4
    return limit, budget


def _choose_spatial_tile(s, c_in, c_out, itemsize, tile_budget,
                         target_x_bytes=4 << 20):
    """Pick the spatial (lane) tile size TS.

    - lane-dense: a multiple of 128 (or the full spatial extent),
    - large enough (~4 MiB of x per step) that HBM bursts are long and the
      ~0.35us grid-step overhead is amortized,
    - small enough that double-buffered in/out blocks PLUS the in-kernel f32
      temporaries fit the generation-aware VMEM budget,
    - capped at 8192 lanes for the tiny-channel VPU path to bound the unrolled
      channel loop's live ranges.
    """
    cin_p, cout_p = _pad8(c_in), _pad8(c_out)
    # Per-spatial-element VMEM cost of one tile:
    #   2x double-buffered input + 2x double-buffered output (native, sublane-padded)
    #   + ~2 output-shaped f32 temporaries (accumulator / product) inside the kernel.
    col_bytes = 2 * cin_p * itemsize + 2 * cout_p * itemsize + 2 * cout_p * 4
    ts_vmem_cap = max(128, tile_budget // col_bytes)
    ts_target = max(512, target_x_bytes // max(c_in * itemsize, 1))
    ts = min(ts_target, ts_vmem_cap)
    if c_in <= 16 and c_out <= 16:
        ts = min(ts, 8192)                  # bound VPU-path live ranges
    if s <= ts:
        return s                            # single full-extent spatial block (always legal)
    return max(128, (ts // 128) * 128)      # lane-aligned; ragged tail masked by Pallas


def outconv_1x1(x_nchw, weight, bias):
    """1x1 Conv2d (PyTorch nn.Conv2d(in_ch, out_ch, kernel_size=1)) forward.

    x_nchw : (N, C_in, H, W)
    weight : (C_out, C_in, 1, 1)   -- PyTorch conv weight layout
    bias   : (C_out,)
    returns: (N, C_out, H, W)
    """
    N, C_in, H, W = x_nchw.shape
    C_out = weight.shape[0]
    S = H * W
    itemsize = x_nchw.dtype.itemsize

    x3 = x_nchw.reshape(N, C_in, S)            # free reshape, stays NCHW-contiguous
    w_mat = weight.reshape(C_out, C_in)        # (C_out, C_in)
    b_col = bias.reshape(C_out, 1)             # (C_out, 1)

    vmem_limit, tile_budget = _vmem_limits()
    ts = _choose_spatial_tile(S, C_in, C_out, itemsize, tile_budget)

    # v7x has 2 TensorCores: keep the grid at >= 2 steps where possible so both
    # cores get work (halved effective HBM bandwidth otherwise).
    if N * pl.cdiv(S, ts) < 2 and S >= 256:
        ts = max(128, ((S // 2) // 128) * 128)

    grid = (N, pl.cdiv(S, ts))

    # Weight/bias: constant index_map -> VMEM-resident, never re-DMA'd.  For big
    # channel counts single-buffer the weight so it doesn't steal VMEM from the
    # spatial tile (meaningful against v7x's 64 MiB).
    w_bytes = C_out * C_in * w_mat.dtype.itemsize
    if w_bytes >= (1 << 20):
        w_spec = pl.BlockSpec((C_out, C_in), lambda n, s: (0, 0),
                              pipeline_mode=pl.Buffered(1))
    else:
        w_spec = pl.BlockSpec((C_out, C_in), lambda n, s: (0, 0))
    b_spec = pl.BlockSpec((C_out, 1), lambda n, s: (0, 0))

    cost = pl.CostEstimate(
        flops=2 * N * S * C_in * C_out,
        transcendentals=0,
        bytes_accessed=(N * C_in * S + N * C_out * S) * itemsize
                       + (C_out * C_in) * w_mat.dtype.itemsize
                       + C_out * b_col.dtype.itemsize,
    )

    out3 = pl.pallas_call(
        _outconv_kernel,
        out_shape=jax.ShapeDtypeStruct((N, C_out, S), x_nchw.dtype),
        grid_spec=pltpu.PrefetchScalarGridSpec(
            num_scalar_prefetch=0,
            grid=grid,
            in_specs=[
                # batch dim squeezed out; spatial tiles live in the lane dim
                pl.BlockSpec((None, C_in, ts), lambda n, s: (n, 0, s)),
                w_spec,
                b_spec,
            ],
            out_specs=pl.BlockSpec((None, C_out, ts), lambda n, s: (n, 0, s)),
        ),
        compiler_params=pltpu.CompilerParams(
            dimension_semantics=("parallel", "parallel"),
            vmem_limit_bytes=vmem_limit,
        ),
        cost_estimate=cost,
    )(x3, w_mat, b_col)

    return out3.reshape(N, C_out, H, W)        # free reshape back to NCHW


def _reference(x, weight, bias):
    """Exact-f32 elementwise reference for a 1x1 conv (no matmul-precision ambiguity)."""
    C_out, C_in = weight.shape[0], weight.shape[1]
    wf = weight.reshape(C_out, C_in).astype(jnp.float32)
    xf = x.astype(jnp.float32)
    out = (xf[:, None] * wf[None, :, :, None, None]).sum(axis=2)
    return out + bias.astype(jnp.float32).reshape(1, C_out, 1, 1)


if __name__ == "__main__":
    key = jax.random.PRNGKey(0)
    k_x, k_w, k_b, k_x2, k_w2, k_b2 = jax.random.split(key, 6)

    # --- test 1: tiny channels -> VPU broadcast-FMA path ---------------------
    N, C_in, H, W = 2, 4, 16, 16
    C_out = 3
    x = jax.random.normal(k_x, (N, C_in, H, W), dtype=jnp.float32)
    weight = jax.random.normal(k_w, (C_out, C_in, 1, 1), dtype=jnp.float32) * 0.1
    bias = jax.random.normal(k_b, (C_out,), dtype=jnp.float32) * 0.1

    out = jax.block_until_ready(outconv_1x1(x, weight, bias))
    ref = _reference(x, weight, bias)
    assert out.shape == (N, C_out, H, W)
    assert jnp.allclose(out, ref, atol=1e-5, rtol=1e-5)

    # --- test 2: larger channels -> MXU path (f32) ---------------------------
    N2, C_in2, H2, W2, C_out2 = 2, 32, 8, 8, 24
    x2 = jax.random.normal(k_x2, (N2, C_in2, H2, W2), dtype=jnp.float32)
    weight2 = jax.random.normal(k_w2, (C_out2, C_in2, 1, 1), dtype=jnp.float32) * 0.1
    bias2 = jax.random.normal(k_b2, (C_out2,), dtype=jnp.float32) * 0.1

    out2 = jax.block_until_ready(outconv_1x1(x2, weight2, bias2))
    ref2 = _reference(x2, weight2, bias2)
    assert out2.shape == (N2, C_out2, H2, W2)
    assert jnp.allclose(out2, ref2, atol=1e-2, rtol=1e-2)

    # --- test 3: bf16 operands fed natively to the MXU (f32 accumulation) ----
    x3 = x2.astype(jnp.bfloat16)
    weight3 = weight2.astype(jnp.bfloat16)
    bias3 = bias2.astype(jnp.bfloat16)
    out3 = jax.block_until_ready(outconv_1x1(x3, weight3, bias3))
    ref3 = _reference(x3, weight3, bias3)
    assert out3.dtype == jnp.bfloat16
    assert jnp.allclose(out3.astype(jnp.float32), ref3, atol=5e-2, rtol=5e-2)

    print("KERNEL_OK")
</pallas_src>

<mosaic_0001>
module attributes {stable_mosaic.version = 11 : i64} {
  func.func @_outconv_kernel(%arg0: i32, %arg1: i32, %arg2: memref<1x4x256xf32, #tpu.memory_space<vmem>>, %arg3: memref<3x4xf32, #tpu.memory_space<vmem>>, %arg4: memref<3x1xf32, #tpu.memory_space<vmem>>, %arg5: memref<1x3x256xf32, #tpu.memory_space<vmem>>) attributes {dimension_semantics = [#tpu.dimension_semantics<parallel>, #tpu.dimension_semantics<parallel>], iteration_bounds = array<i64: 2, 1>, scalar_prefetch = 0 : i64, scratch_operands = 0 : i64, tpu.core_type = #tpu.core_type<tc>, window_params = [{transform_indices = @transform_0, window_bounds = array<i64: 1, 4, 256>}, {pipeline_mode = #tpu.pipeline_mode<synchronous>, transform_indices = @transform_1, window_bounds = array<i64: 3, 4>}, {pipeline_mode = #tpu.pipeline_mode<synchronous>, transform_indices = @transform_2, window_bounds = array<i64: 3, 1>}, {transform_indices = @transform_3, window_bounds = array<i64: 1, 3, 256>}]} {
    %c0 = arith.constant 0 : index
    %c0_0 = arith.constant 0 : index
    %0 = vector.load %arg4[%c0, %c0_0] : memref<3x1xf32, #tpu.memory_space<vmem>>, vector<3x1xf32>
    %1 = vector.shape_cast %0 : vector<3x1xf32> to vector<3x1xf32>
    %2 = vector.broadcast %1 : vector<3x1xf32> to vector<3x256xf32>
    %c0_1 = arith.constant 0 : index
    %c0_2 = arith.constant 0 : index
    %3 = vector.load %arg3[%c0_1, %c0_2] : memref<3x4xf32, #tpu.memory_space<vmem>>, vector<3x1xf32>
    %c0_3 = arith.constant 0 : index
    %c0_4 = arith.constant 0 : index
    %c0_5 = arith.constant 0 : index
    %4 = vector.load %arg2[%c0_3, %c0_4, %c0_5] : memref<1x4x256xf32, #tpu.memory_space<vmem>>, vector<1x1x256xf32>
    %5 = vector.shape_cast %4 : vector<1x1x256xf32> to vector<1x256xf32>
    %6 = vector.broadcast %3 : vector<3x1xf32> to vector<3x256xf32>
    %7 = vector.broadcast %5 : vector<1x256xf32> to vector<3x256xf32>
    %8 = arith.mulf %6, %7 : vector<3x256xf32>
    %9 = arith.addf %2, %8 : vector<3x256xf32>
    %c0_6 = arith.constant 0 : index
    %c1 = arith.constant 1 : index
    %10 = vector.load %arg3[%c0_6, %c1] : memref<3x4xf32, #tpu.memory_space<vmem>>, vector<3x1xf32>
    %c0_7 = arith.constant 0 : index
    %c1_8 = arith.constant 1 : index
    %c0_9 = arith.constant 0 : index
    %11 = vector.load %arg2[%c0_7, %c1_8, %c0_9] : memref<1x4x256xf32, #tpu.memory_space<vmem>>, vector<1x1x256xf32>
    %12 = vector.shape_cast %11 : vector<1x1x256xf32> to vector<1x256xf32>
    %13 = vector.broadcast %10 : vector<3x1xf32> to vector<3x256xf32>
    %14 = vector.broadcast %12 : vector<1x256xf32> to vector<3x256xf32>
    %15 = arith.mulf %13, %14 : vector<3x256xf32>
    %16 = arith.addf %9, %15 : vector<3x256xf32>
    %c0_10 = arith.constant 0 : index
    %c2 = arith.constant 2 : index
    %17 = vector.load %arg3[%c0_10, %c2] : memref<3x4xf32, #tpu.memory_space<vmem>>, vector<3x1xf32>
    %c0_11 = arith.constant 0 : index
    %c2_12 = arith.constant 2 : index
    %c0_13 = arith.constant 0 : index
    %18 = vector.load %arg2[%c0_11, %c2_12, %c0_13] : memref<1x4x256xf32, #tpu.memory_space<vmem>>, vector<1x1x256xf32>
    %19 = vector.shape_cast %18 : vector<1x1x256xf32> to vector<1x256xf32>
    %20 = vector.broadcast %17 : vector<3x1xf32> to vector<3x256xf32>
    %21 = vector.broadcast %19 : vector<1x256xf32> to vector<3x256xf32>
    %22 = arith.mulf %20, %21 : vector<3x256xf32>
    %23 = arith.addf %16, %22 : vector<3x256xf32>
    %c0_14 = arith.constant 0 : index
    %c3 = arith.constant 3 : index
    %24 = vector.load %arg3[%c0_14, %c3] : memref<3x4xf32, #tpu.memory_space<vmem>>, vector<3x1xf32>
    %c0_15 = arith.constant 0 : index
    %c3_16 = arith.constant 3 : index
    %c0_17 = arith.constant 0 : index
    %25 = vector.load %arg2[%c0_15, %c3_16, %c0_17] : memref<1x4x256xf32, #tpu.memory_space<vmem>>, vector<1x1x256xf32>
    %26 = vector.shape_cast %25 : vector<1x1x256xf32> to vector<1x256xf32>
    %27 = vector.broadcast %24 : vector<3x1xf32> to vector<3x256xf32>
    %28 = vector.broadcast %26 : vector<1x256xf32> to vector<3x256xf32>
    %29 = arith.mulf %27, %28 : vector<3x256xf32>
    %30 = arith.addf %23, %29 : vector<3x256xf32>
    %c0_18 = arith.constant 0 : index
    %c0_19 = arith.constant 0 : index
    %c0_20 = arith.constant 0 : index
    %31 = vector.load %arg5[%c0_18, %c0_19, %c0_20] : memref<1x3x256xf32, #tpu.memory_space<vmem>>, vector<1x3x256xf32>
    %32 = vector.shape_cast %31 : vector<1x3x256xf32> to vector<3x256xf32>
    %33 = vector.shape_cast %30 : vector<3x256xf32> to vector<1x3x256xf32>
    tpu.vector_store %arg5[%c0_18, %c0_19, %c0_20], %33 {strides = array<i32>} : memref<1x3x256xf32, #tpu.memory_space<vmem>>, vector<1x3x256xf32>,
    return
  }
  func.func @transform_0(%arg0: i32, %arg1: i32) -> (i32, i32, i32) {
    %c0_i32 = arith.constant 0 : i32
    %c0_i32_0 = arith.constant 0 : i32
    return %arg0, %c0_i32, %arg1 : i32, i32, i32
  }
  func.func @transform_1(%arg0: i32, %arg1: i32) -> (i32, i32) {
    %c0_i32 = arith.constant 0 : i32
    %c0_i32_0 = arith.constant 0 : i32
    %c0_i32_1 = arith.constant 0 : i32
    return %c0_i32, %c0_i32_0 : i32, i32
  }
  func.func @transform_2(%arg0: i32, %arg1: i32) -> (i32, i32) {
    %c0_i32 = arith.constant 0 : i32
    %c0_i32_0 = arith.constant 0 : i32
    %c0_i32_1 = arith.constant 0 : i32
    return %c0_i32, %c0_i32_0 : i32, i32
  }
  func.func @transform_3(%arg0: i32, %arg1: i32) -> (i32, i32, i32) {
    %c0_i32 = arith.constant 0 : i32
    %c0_i32_0 = arith.constant 0 : i32
    return %arg0, %c0_i32, %arg1 : i32, i32, i32
  }
}

</mosaic_0001>

<bundles_post_ra>
// kernel: tpu_custom_call.1
= control target key start
LH: loop header
LB: loop body
LE: loop exit
PB: predicated region body
PF: predicated region fallthrough
CT: control target
= control target key end

     0   :  { %8 = vsyncpa [#allocation3], 0  ;;  %s733_s0 = inlined_call_operand.hbm [shape: f32[2,4,256], index: 0, kind: input, shape index: {}]   ;;  %s734_s1 = inlined_call_operand.vmem [shape: f32[3,4], index: 1, kind: input, shape index: {}]   ;;  %s735_s2 = inlined_call_operand.vmem [shape: f32[3,1], index: 2, kind: input, shape index: {}]   ;;  %s736_s3 = inlined_call_operand.vmem [shape: f32[2,3,256], index: 3, kind: output, shape index: {}]  }
   0x1   :  { %10 = vsyncpa [#allocation3 + $0x1], 0  ;;  %s596_s12 = smov 0   ;;  %s598_s13 = smov 0  }
   0x2   :  { %s600_s14 = smov 0   ;;  %s602_s15 = smov 0  }
   0x3   :  { %s604_s16 = smov 0   ;;  %s606_s17 = smov 0  }
   0x4 LB: > { %s408_s18 = sadd.s32 4294967295, %s569_s17   ;;  %s28_s19 = sadd.s32 1, %s565_s16  ;;  %s569_s17 = sphi %s606_s17, %s16_s17   ;;  %s565_s16 = sphi %s604_s16, %s746_s16   ;;  %s561_s15 = sphi %s602_s15, %s745_s15   ;;  %s557_s14 = sphi %s600_s14, %s744_s14   ;;  %s553_s13 = sphi %s598_s13, %s743_s13   ;;  %s549_s12 = sphi %s596_s12, %s742_s12  }
   0x5   : > { %p30_p0 = scmp.ge.s32.totalorder %s28_s19, 2  ;;  %s37_s20 = sadd.s32 1, %s557_s14 }
   0x6   : > { %p44_p1 = scmp.ne.s32.totalorder %s557_s14, %s553_s13  ;;  %p45_p2 = scmp.eq.s32.totalorder %s569_s17, 0 }
   0x7   : > { %s748_s19 = smov (%p30_p0, %s28_s19), 0  ;;  %p50_p4 = scmp.ne.s32.totalorder %s553_s13, %s549_s12 }
   0x8   : > { %p632_p3 = por %p45_p2, %p44_p1  ;;  %s32_s22 = ssub.s32 %s565_s16, %s748_s19 }
   0x9   : > { %p51_p5 = scmp.eq.s32.totalorder %s408_s18, 0  ;;  %p35_p6 = scmp.eq.s32.totalorder %s32_s22, 0 }
   0xa   : > { %p432_p8 = scmp.lt.s32.totalorder %s569_s17, 2  ;;  %s150_s25 = sand.u32 1, %s557_s14  }
   0xb   : > { %p639_p7 = por %p51_p5, %p50_p4  ;;  %s424_s26 = sshll.u32 %s565_s16, 7 }
   0xc   : > { %s645_s24 = scalar_select %p35_p6, %s557_s14, %s37_s20  }
   0xd   : > { %s412_s27 = sshll.u32 %s150_s25, 3  ;;  %s652_s30 = scalar_lea.hbm %s733_s0, %s424_s26 }
   0xe   : > { %s154_s4 = scalar_lea.vmem [#allocation2], %s412_s27  ;;  %p656_p9 = pnand %p432_p8, %p632_p3 }
   0xf   : > { %s164_s5 = sshll.u32 %s154_s4, 4  ;;  %s151_s7 = scalar_lea.sflag [#allocation3], %s150_s25  ;;  %s660_s5 = int_to_ptr.vmem [resolvable:$true] %s164_s5 }
  0x10   : > { %s489_s8 = scalar_lea.hbm %s652_s30, 128  ;;  %p491_p13 = pneg %p656_p9 }
  0x11   : > { %p490_p12 = scmp.ne.s32.totalorder %s652_s30, %s489_s8  ;;  %s494_s11 = scalar_lea.hbm %s733_s0, 256 }
  0x12   : > { %p495_p2 = scmp.lt.u32.totalorder %s652_s30, %s733_s0  ;;  %p496_p3 = scmp.lt.u32.totalorder %s494_s11, %s489_s8 }
  0x13   : > { %p492_p0 = pnand %p491_p13, %p490_p12  ;;  %p498_p5 = scmp.lt.u32.totalorder %s489_s8, %s652_s30 }
  0x14   : > { %p497_p4 = por %p496_p3, %p495_p2 }
  0x15   : > { %p493_p1 = pneg %p492_p0 }
  0x16   : > { %p499_p6 = por %p498_p5, %p497_p4 }
  0x18   : > { %p500_p8 = pnand %p499_p6, %p493_p1 }
  0x1a   : > { %503 = shalt.err (!%p500_p8)
}
  0x1b   : > { %s504_s20 = scalar_lea.vmem %s660_s5, 128  ;;  %s571_s21 = smov [#allocation2]  }
  0x1c   : > { %p505_p12 = scmp.ne.s32.totalorder %s660_s5, %s504_s20  ;;  %s509_s22 = sshll.u32 %s571_s21, 4  ;;  %s510_s22 = int_to_ptr.vmem [resolvable:$false] %s509_s22 }
  0x1d   : > { %s511_s25 = scalar_lea.vmem %s510_s22, 256  ;;  %p512_p11 = scmp.lt.s32.totalorder %s660_s5, %s510_s22 }
  0x1e   : > { %p507_p0 = pnand %p505_p12, %p491_p13  ;;  %p513_p2 = scmp.lt.s32.totalorder %s511_s25, %s504_s20 }
  0x20   : > { %p508_p10 = pneg %p507_p0  ;;  %p514_p3 = por %p513_p2, %p512_p11 }
  0x22   : > { %p515_p4 = pnand %p514_p3, %p508_p10 }
  0x24   : > { %518 = shalt.err (!%p515_p4)
}
  0x25   : > { %431 = dma.hbm_to_vmem [thread:$0]  (!%p656_p9), %s652_s30, 128, %s660_s5, %s151_s7  }
  0x26   : > { %p740_p1 = scmp.lt.s32.totalorder %s569_s17, 3  ;;  %p741_p5 = scmp.ge.s32.totalorder %s569_s17, 1 }
  0x28   : > { %p170_p13 = pnand %p741_p5, %p740_p1 }
  0x29   : > { %s175_s26 = sand.u32 (!%p170_p13), 1, %s553_s13  }
  0x2a   : > { %173 = sbr.rel (%p170_p13) target bundleno = 196 (0xc4), region = 32  ;;  %s416_s27 = sshll.u32 (!%p170_p13), %s175_s26, 3 }
  0x2b   : > { %s176_s28 = scalar_lea.sflag (!%p170_p13), [#allocation3], %s175_s26  ;;  %s694_s29 = scalar_lea.vmem (!%p170_p13), [#allocation2], %s416_s27 }
  0x31   : > { %544 = dma.done.wait (%p639_p7), %s176_s28, 128  }
  0x32   : > { %546 = vsyncadd (%p639_p7), %s176_s28, 4294967168  ;;  %v572_v0 = vmov 0   ;;  %v573_v1 = vmov 1   ;;  %v223_v2 = vld [vmem:[%s734_s1] sm:$0x7]  ;;  %v574_v4 = vmov 2   ;;  %v231_v6 = vlaneseq }
  0x33   : > { %485 = vset.pattern.permute.xlu0 %v572_v0  ;;  %486 = vset.pattern.permute.xlu1 %v573_v1  ;;  %v217_v3 = vld [vmem:[%s735_s2] sm:$0x7]  ;;  %v575_v5 = vmov 3   ;;  %p208_p7 = scmp.lt.s32.totalorder %s561_s15, 1 }
  0x34   : > { %227 = vperm.xlu0 %485, %v223_v2   ;;  %248 = vperm.xlu1 %486, %v223_v2   ;;  %v232_v7 = vshrl.u32 %v231_v6, 7  ;;  %v224_v10 = vld [vmem:[%s694_s29] ss:$4 sm:$0x3] }
  0x35   : > { %v419_v11 = vld [vmem:[%s694_s29 + $0x1] ss:$4 sm:$0x3]  ;;  %v420_v14 = vld [vmem:[%s694_s29 + $0x2] ss:$4 sm:$0x3] }
  0x36   : > { %v233_v8 = vsub.s32 0, %v232_v7  ;;  %v237_v9 = vsub.s32 1, %v232_v7  ;;  %v421_v23 = vld [vmem:[%s694_s29 + $0x3] ss:$4 sm:$0x3]  ;;  %s750_s15 = smov (!%p208_p7, %s561_s15), 1 }
  0x37   : > { %s425_s23 = sshll.u32 %s750_s15, 3 }
  0x38   : > { %220 = vperm.xlu0 %485, %v217_v3   ;;  %487 = vset.pattern.permute.xlu1 %v574_v4  ;;  %v234_v12 = vrot.slane %v224_v10, %v233_v8  ;;  %v238_v13 = vrot.slane %v224_v10, %v237_v9  ;;  %v255_v17 = vrot.slane %v419_v11, %v233_v8  ;;  %s215_s9 = scalar_lea.vmem %s736_s3, %s425_s23 }
  0x39   : > { %269 = vperm.xlu1 %487, %v223_v2   ;;  %v259_v18 = vrot.slane %v419_v11, %v237_v9  ;;  %v276_v19 = vrot.slane %v420_v14, %v233_v8  ;;  %v280_v20 = vrot.slane %v420_v14, %v237_v9  ;;  %v297_v32 = vrot.slane %v421_v23, %v233_v8 }
  0x3a   : > { %v301_v33 = vrot.slane %v421_v23, %v237_v9 }
  0x3c   : > { %488 = vset.pattern.permute.xlu0 %v575_v5 }
  0x3d   : > { %290 = vperm.xlu0 %488, %v223_v2  }
  0xb3   : > { %v228_v15 = vpop.permute.xlu0 %227  ;;  %v249_v16 = vpop.permute.xlu1 %248 }
  0xb4   : > { %v241_v21 = vmul.f32 %v234_v12, %v228_v15  ;;  %v242_v22 = vmul.f32 %v238_v13, %v228_v15  ;;  %v262_v25 = vmul.f32 %v255_v17, %v249_v16  ;;  %v263_v26 = vmul.f32 %v259_v18, %v249_v16 }
  0xb7   : > { %v221_v24 = vpop.permute.xlu0 %220 }
  0xb8   : > { %v243_v27 = vadd.f32 %v241_v21, %v221_v24  ;;  %v244_v28 = vadd.f32 %v242_v22, %v221_v24  ;;  %v270_v29 = vpop.permute.xlu1 %269 }
  0xb9   : > { %v283_v30 = vmul.f32 %v276_v19, %v270_v29  ;;  %v284_v31 = vmul.f32 %v280_v20, %v270_v29 }
  0xba   : > { %v264_v34 = vadd.f32 %v262_v25, %v243_v27  ;;  %v265_v35 = vadd.f32 %v263_v26, %v244_v28 }
  0xbc   : > { %v285_v36 = vadd.f32 %v283_v30, %v264_v34  ;;  %v286_v37 = vadd.f32 %v284_v31, %v265_v35  ;;  %v291_v38 = vpop.permute.xlu0 %290 }
  0xbd   : > { %v304_v39 = vmul.f32 %v297_v32, %v291_v38  ;;  %v305_v40 = vmul.f32 %v301_v33, %v291_v38 }
  0xbf   : > { %v306_v41 = vadd.f32 %v304_v39, %v285_v36  ;;  %v307_v42 = vadd.f32 %v305_v40, %v286_v37 }
  0xc1   : > { %v310_v43 = vcombine.low %v306_v41, %v307_v42 }
  0xc3   : > { %312 = vst [vmem:[%s215_s9] sm:$0x77] %v310_v43 }
  0xc4 PF: > { %s16_s17 = sadd.s32 1, %s569_s17   ;;  %s742_s12 = smov %s553_s13 }
  0xc5   : > { %p13_p9 = scmp.ge.s32.totalorder %s16_s17, 4   ;;  %s743_s13 = smov %s557_s14 }
  0xc6   : > { %s744_s14 = smov %s645_s24  ;;  %s745_s15 = smov %s565_s16 }
  0xc7   : > { %s746_s16 = smov %s748_s19  ;;  %15 = sbr.rel (!%p13_p9) target bundleno = 4 (0x4), region = 75 }
  0xce   :  { %343 = vsyncpa [#allocation3], 1 }
  0xcf   :  { %345 = vsyncpa [#allocation3 + $0x1], 1 }

</bundles_post_ra>
